<compile_context>
chip_gen: v5e
topology: v5e:2x2
jax: 0.10.0
libtpu: 0.0.40
codegen_flags: <defaults>
</compile_context>

<pallas_src>
import numpy as np
import jax
import jax.numpy as jnp
from jax.experimental import pallas as pl
from jax.experimental.pallas import tpu as pltpu


def _pos_embed_kernel(sin_y_ref, sin_x_ref, o_ref):
    """Fill one (2F, th, tw) output block from the rank-1 sin/cos factors.

    sin_y_ref: (F, th, 1)  -- per-row factors for this H tile
    sin_x_ref: (F, 1, tw)  -- per-column factors for this W tile
    o_ref:     (2F, th, tw)
    """
    F, th, _ = sin_y_ref.shape
    tw = sin_x_ref.shape[-1]
    # y-half: depends only on the row -> lane broadcast of (F, th, 1).
    o_ref[:F] = jnp.broadcast_to(sin_y_ref[...], (F, th, tw))
    # x-half: depends only on the column -> sublane broadcast of (F, 1, tw).
    o_ref[F:] = jnp.broadcast_to(sin_x_ref[...], (F, th, tw))


def _choose_tiles(H, W, F2, max_block_bytes):
    """Pick (th, tw) for (F2, th, tw) output blocks.

    Constraints: tw must be a multiple of 128 or equal W; th a multiple of 8
    or equal H.  Heuristics: keep each block <= ~max_block_bytes (so the
    double-buffered output stays comfortably inside v5e/v7x scoped-VMEM
    defaults) and give the grid >= 2-4 steps so the HBM writeback pipelines
    and both v7x TensorCores get work.
    """
    # Lane (W) tile.
    if W <= 128:
        tw = W
    else:
        min_h_bytes = F2 * 8 * 4                        # bytes per lane at th=8
        tw_budget = (max_block_bytes // min_h_bytes) // 128 * 128
        tw = max(128, min(tw_budget, W))
        if tw >= W:
            tw = W                                      # full width, no W tiling
    # Sublane (H) tile.
    bytes_per_row = F2 * tw * 4
    th_budget = max(8, (max_block_bytes // bytes_per_row) // 8 * 8)
    if H >= 32:
        th_target = max(8, (H // 4) // 8 * 8)           # aim for >= 4 H steps
    elif H >= 16:
        th_target = max(8, (H // 2) // 8 * 8)           # aim for >= 2 H steps
    else:
        th_target = H
    th = min(th_budget, th_target)
    if th >= H:
        th = H
    return th, tw


def position_embedding_matrix(x, num_pos_feats=64, scale=None,
                              temperature=100000.0,
                              max_block_bytes=2 * 1024 * 1024):
    """Pallas equivalent of PositionEmbeddingMatrix.forward(x). x: (C, H, W)."""
    C, H, W = x.shape            # only the shape is used, matching the module
    F = int(num_pos_feats)
    F2 = 2 * F

    th, tw = _choose_tiles(H, W, F2, max_block_bytes)
    nH = pl.cdiv(H, th)
    nW = pl.cdiv(W, tw)
    H_pad = nH * th              # padded rows/cols are clipped by the output DMA
    W_pad = nW * tw

    # Feature-axis constants, computed once on the host in float64:
    #   inv_dim[k] = temperature ** (-2*(k//2)/F)   (reciprocal of dim_t)
    #   phase[k]   = (k % 2) * pi/2                 (cos(x) == sin(x + pi/2))
    k = np.arange(F, dtype=np.float64)
    inv_dim = np.power(np.float64(temperature), -(2.0 * np.floor(k / 2.0)) / F)
    phase = (k % 2.0) * (np.pi / 2.0)
    inv_dim_f = jnp.asarray(inv_dim, dtype=jnp.float32)[:, None]   # (F, 1)
    phase_f = jnp.asarray(phase, dtype=jnp.float32)[:, None]       # (F, 1)

    # Fold the optional scale normalisation into per-axis multipliers.
    if scale is not None:
        eps = 1e-6
        y_scale = float(scale) / (float(H - 1) + eps)
        x_scale = float(scale) / (float(W - 1) + eps)
    else:
        y_scale = 1.0
        x_scale = 1.0

    # Tiny rank-1 factor tables: F*(H+W) sins total (vs 2*F*H*W outputs).
    ys = jnp.arange(H_pad, dtype=jnp.float32) * jnp.float32(y_scale)
    xs = jnp.arange(W_pad, dtype=jnp.float32) * jnp.float32(x_scale)
    sin_y = jnp.sin(ys[None, :] * inv_dim_f + phase_f)             # (F, H_pad)
    sin_x = jnp.sin(xs[None, :] * inv_dim_f + phase_f)             # (F, W_pad)

    # Pre-pack per grid tile so the kernel only does unit-dim broadcasts.
    sin_y_p = sin_y.reshape(F, nH, th).transpose(1, 0, 2)[..., None]     # (nH,F,th,1)
    sin_x_p = sin_x.reshape(F, nW, tw).transpose(1, 0, 2)[:, :, None, :]  # (nW,F,1,tw)

    pos = pl.pallas_call(
        _pos_embed_kernel,
        out_shape=jax.ShapeDtypeStruct((F2, H, W), jnp.float32),
        grid=(nH, nW),
        in_specs=[
            pl.BlockSpec((None, F, th, 1), lambda i, j: (i, 0, 0, 0)),
            pl.BlockSpec((None, F, 1, tw), lambda i, j: (j, 0, 0, 0)),
        ],
        out_specs=pl.BlockSpec((F2, th, tw), lambda i, j: (0, i, j)),
        compiler_params=pltpu.CompilerParams(
            dimension_semantics=("parallel", "parallel")),
    )(sin_y_p, sin_x_p)
    return pos


def _reference(H, W, num_pos_feats=64, scale=None, temperature=100000.0):
    """Pure-JAX reference mirroring the torch code exactly (for validation)."""
    y = jnp.broadcast_to(jnp.arange(H, dtype=jnp.float32)[:, None], (H, W))
    x = jnp.broadcast_to(jnp.arange(W, dtype=jnp.float32)[None, :], (H, W))
    if scale is not None:
        eps = 1e-6
        y = y / (y[-1:, :] + eps) * scale
        x = x / (x[:, -1:] + eps) * scale
    dim_t = jnp.arange(num_pos_feats, dtype=jnp.float32)
    dim_t = temperature ** (2 * jnp.floor(dim_t / 2) / num_pos_feats)
    px = x[:, :, None] / dim_t[None, None, :]
    py = y[:, :, None] / dim_t[None, None, :]
    px = jnp.stack((jnp.sin(px[:, :, 0::2]), jnp.cos(px[:, :, 1::2])),
                   axis=3).reshape(H, W, num_pos_feats)
    py = jnp.stack((jnp.sin(py[:, :, 0::2]), jnp.cos(py[:, :, 1::2])),
                   axis=3).reshape(H, W, num_pos_feats)
    pos = jnp.concatenate((py, px), axis=2)
    return jnp.transpose(pos, (2, 0, 1))


if __name__ == "__main__":
    key = jax.random.PRNGKey(0)
    # Module takes an unbatched (C, H, W) tensor; values are unused by forward.
    C, H, W = 4, 16, 16
    F = 64
    x = jax.random.normal(key, (C, H, W), dtype=jnp.float32)
    # Tolerance slightly looser than machine eps: the kernel uses sin(x+pi/2)
    # for cos and a precomputed reciprocal of dim_t (few-ULP reassociation).
    rtol, atol = 1e-5, 5e-5

    # 1) default config: th=8 -> grid (2, 1)  (multi-step, pipelined output)
    pos = jax.block_until_ready(position_embedding_matrix(x, num_pos_feats=F))
    assert pos.shape == (2 * F, H, W), pos.shape
    assert pos.dtype == jnp.float32
    ref = _reference(H, W, num_pos_feats=F)
    assert jnp.allclose(pos, ref, rtol=rtol, atol=atol), (
        float(jnp.max(jnp.abs(pos - ref))))

    # 2) scale-normalisation branch
    scale = 2.0 * np.pi
    pos_s = jax.block_until_ready(
        position_embedding_matrix(x, num_pos_feats=F, scale=scale))
    ref_s = _reference(H, W, num_pos_feats=F, scale=scale)
    assert jnp.allclose(pos_s, ref_s, rtol=rtol, atol=atol), (
        float(jnp.max(jnp.abs(pos_s - ref_s))))

    # 3) ragged H tiling (H=20 -> grid (3,1), last block clipped), non-pow2 W
    H2, W2, F3 = 20, 24, 32
    x2 = jax.random.normal(key, (C, H2, W2), dtype=jnp.float32)
    pos2 = jax.block_until_ready(position_embedding_matrix(x2, num_pos_feats=F3))
    ref2 = _reference(H2, W2, num_pos_feats=F3)
    assert pos2.shape == (2 * F3, H2, W2), pos2.shape
    assert jnp.allclose(pos2, ref2, rtol=rtol, atol=atol), (
        float(jnp.max(jnp.abs(pos2 - ref2))))

    # 4) wide map forcing lane (W) tiling: tw=128 -> grid (2, 2)
    H3, W3, F4 = 16, 256, 8
    x3 = jax.random.normal(key, (C, H3, W3), dtype=jnp.float32)
    pos3 = jax.block_until_ready(
        position_embedding_matrix(x3, num_pos_feats=F4, scale=scale,
                                  max_block_bytes=32 * 1024))
    ref3 = _reference(H3, W3, num_pos_feats=F4, scale=scale)
    assert pos3.shape == (2 * F4, H3, W3), pos3.shape
    assert jnp.allclose(pos3, ref3, rtol=rtol, atol=atol), (
        float(jnp.max(jnp.abs(pos3 - ref3))))

    print("KERNEL_OK")
</pallas_src>

<mosaic_0001>
module attributes {stable_mosaic.version = 11 : i64} {
  func.func @_pos_embed_kernel(%arg0: i32, %arg1: i32, %arg2: memref<1x64x8x1xf32, #tpu.memory_space<vmem>>, %arg3: memref<1x64x1x16xf32, #tpu.memory_space<vmem>>, %arg4: memref<128x8x16xf32, #tpu.memory_space<vmem>>) attributes {dimension_semantics = [#tpu.dimension_semantics<parallel>, #tpu.dimension_semantics<parallel>], iteration_bounds = array<i64: 2, 1>, scalar_prefetch = 0 : i64, scratch_operands = 0 : i64, tpu.core_type = #tpu.core_type<tc>, window_params = [{transform_indices = @transform_0, window_bounds = array<i64: 1, 64, 8, 1>}, {transform_indices = @transform_1, window_bounds = array<i64: 1, 64, 1, 16>}, {transform_indices = @transform_2, window_bounds = array<i64: 128, 8, 16>}]} {
    %c0 = arith.constant 0 : index
    %c0_0 = arith.constant 0 : index
    %c0_1 = arith.constant 0 : index
    %c0_2 = arith.constant 0 : index
    %0 = vector.load %arg2[%c0, %c0_0, %c0_1, %c0_2] : memref<1x64x8x1xf32, #tpu.memory_space<vmem>>, vector<1x64x8x1xf32>
    %1 = vector.shape_cast %0 : vector<1x64x8x1xf32> to vector<64x8x1xf32>
    %2 = vector.shape_cast %1 : vector<64x8x1xf32> to vector<64x8x1xf32>
    %3 = vector.broadcast %2 : vector<64x8x1xf32> to vector<64x8x16xf32>
    %c0_3 = arith.constant 0 : index
    %c0_4 = arith.constant 0 : index
    %c0_5 = arith.constant 0 : index
    %4 = vector.load %arg4[%c0_3, %c0_4, %c0_5] : memref<128x8x16xf32, #tpu.memory_space<vmem>>, vector<64x8x16xf32>
    tpu.vector_store %arg4[%c0_3, %c0_4, %c0_5], %3 {strides = array<i32>} : memref<128x8x16xf32, #tpu.memory_space<vmem>>, vector<64x8x16xf32>,
    %c0_6 = arith.constant 0 : index
    %c0_7 = arith.constant 0 : index
    %c0_8 = arith.constant 0 : index
    %c0_9 = arith.constant 0 : index
    %5 = vector.load %arg3[%c0_6, %c0_7, %c0_8, %c0_9] : memref<1x64x1x16xf32, #tpu.memory_space<vmem>>, vector<1x64x1x16xf32>
    %6 = vector.shape_cast %5 : vector<1x64x1x16xf32> to vector<64x1x16xf32>
    %7 = vector.shape_cast %6 : vector<64x1x16xf32> to vector<64x1x16xf32>
    %8 = vector.broadcast %7 : vector<64x1x16xf32> to vector<64x8x16xf32>
    %c64 = arith.constant 64 : index
    %c0_10 = arith.constant 0 : index
    %c0_11 = arith.constant 0 : index
    %9 = vector.load %arg4[%c64, %c0_10, %c0_11] : memref<128x8x16xf32, #tpu.memory_space<vmem>>, vector<64x8x16xf32>
    tpu.vector_store %arg4[%c64, %c0_10, %c0_11], %8 {strides = array<i32>} : memref<128x8x16xf32, #tpu.memory_space<vmem>>, vector<64x8x16xf32>,
    return
  }
  func.func @transform_0(%arg0: i32, %arg1: i32) -> (i32, i32, i32, i32) {
    %c0_i32 = arith.constant 0 : i32
    %c0_i32_0 = arith.constant 0 : i32
    %c0_i32_1 = arith.constant 0 : i32
    %c0_i32_2 = arith.constant 0 : i32
    return %arg0, %c0_i32, %c0_i32_0, %c0_i32_1 : i32, i32, i32, i32
  }
  func.func @transform_1(%arg0: i32, %arg1: i32) -> (i32, i32, i32, i32) {
    %c0_i32 = arith.constant 0 : i32
    %c0_i32_0 = arith.constant 0 : i32
    %c0_i32_1 = arith.constant 0 : i32
    %c0_i32_2 = arith.constant 0 : i32
    return %arg1, %c0_i32, %c0_i32_0, %c0_i32_1 : i32, i32, i32, i32
  }
  func.func @transform_2(%arg0: i32, %arg1: i32) -> (i32, i32, i32) {
    %c0_i32 = arith.constant 0 : i32
    %c0_i32_0 = arith.constant 0 : i32
    return %c0_i32, %arg0, %arg1 : i32, i32, i32
  }
}

</mosaic_0001>

<bundles_post_ra>
// kernel: tpu_custom_call.1
= control target key start
LH: loop header
LB: loop body
LE: loop exit
PB: predicated region body
PF: predicated region fallthrough
CT: control target
= control target key end

     0   :  { %s1807_s9 = smov 0   ;;  %s1809_s10 = smov 0   ;;  %s2651_s0 = inlined_call_operand.vmem [shape: f32[2,64,8,1], index: 0, kind: input, shape index: {}]   ;;  %s2652_s1 = inlined_call_operand.vmem [shape: f32[1,64,1,16], index: 1, kind: input, shape index: {}]   ;;  %s2653_s2 = inlined_call_operand.vmem [shape: f32[128,16,16], index: 2, kind: output, shape index: {}]  }
   0x1   :  { %s1811_s11 = smov 0   ;;  %s1813_s12 = smov 0  }
   0x2   :  { %s1815_s13 = smov 0  }
   0x3 LB: > { %s1565_s14 = sadd.s32 4294967295, %s1789_s13   ;;  %s24_s15 = sadd.s32 1, %s1785_s12  ;;  %s1789_s13 = sphi %s1815_s13, %s12_s13   ;;  %s1785_s12 = sphi %s1813_s12, %s2658_s12   ;;  %s1781_s11 = sphi %s1811_s11, %s2657_s11   ;;  %s1777_s10 = sphi %s1809_s10, %s2656_s10   ;;  %s1773_s9 = sphi %s1807_s9, %s2655_s9  }
   0x4   : > { %p26_p0 = scmp.ge.s32.totalorder %s24_s15, 2  ;;  %s85_s16 = sadd.s32 1, %s1777_s10 }
   0x5   : > { %p95_p1 = scmp.ne.s32.totalorder %s1777_s10, %s1773_s9  ;;  %p96_p2 = scmp.eq.s32.totalorder %s1565_s14, 1 }
   0x6   : > { %s2660_s15 = smov (%p26_p0, %s24_s15), 0  ;;  %p1570_p4 = scmp.ge.s32.totalorder %s1789_s13, 1 }
   0x7   : > { %p1839_p3 = por %p96_p2, %p95_p1  ;;  %s80_s18 = ssub.s32 %s1785_s12, %s2660_s15 }
   0x8   : > { %p135_p5 = scmp.lt.s32.totalorder %s1789_s13, 3  ;;  %p83_p6 = scmp.eq.s32.totalorder %s80_s18, 0 }
   0xa   : > { %p136_p7 = pnand %p1570_p4, %p135_p5 }
   0xb   : > { %s1848_s19 = scalar_select %p83_p6, %s1777_s10, %s85_s16  }
   0xc   : > { %139 = sbr.rel (%p136_p7) target bundleno = 400 (0x190), region = 28  ;;  %p160_p8 = scmp.lt.s32.totalorder (!%p136_p7), %s1781_s11, 1 }
   0xd   : > { %s157_s25 = sand.u32 (!%p136_p7), 1, %s1773_s9  }
   0xe   : > { %s1571_s26 = sshll.u32 (!%p136_p7), %s157_s25, 10 }
   0xf   : > { %s1894_s27 = scalar_lea.vmem (!%p136_p7), [#allocation2], %s1571_s26 }
  0x11   : > { %v1791_v0 = vmov 0   ;;  %s161_s20 = scalar_select %p160_p8, %s1781_s11, 1  ;;  %vm553_vm0 = vcmask 130048  }
  0x12   : > { %1686 = vset.pattern.permute.xlu2 %v1791_v0  ;;  %1685 = vset.pattern.permute.xlu1 %v1791_v0  ;;  %s1639_s8 = sshll.u32 (%p1839_p3), %s1781_s11, 3 }
  0x13   : > { %1684 = vset.pattern.permute.xlu0 %v1791_v0  ;;  %s1642_s21 = sshll.u32 %s161_s20, 9  ;;  %s2380_s16 = scalar_lea.vmem (%p1839_p3), %s2653_s2, %s1639_s8 }
  0x14   : > { %s1855_s24 = scalar_lea.vmem %s2651_s0, %s1642_s21 }
  0x15   : > { %v173_v1 = vld [vmem:[%s1855_s24 + $0x20] sm:$0xff]  ;;  %v171_v2 = vld [vmem:[%s1855_s24 + $0x10] sm:$0xff]  ;;  %v174_v4 = vld [vmem:[%s1855_s24 + $0x28] sm:$0xff] }
  0x16   : > { %v169_v3 = vld [vmem:[%s1855_s24] sm:$0xff]  ;;  %255 = vperm.xlu2 %1686, %v173_v1   ;;  %245 = vperm.xlu1 %1685, %v171_v2   ;;  %v172_v5 = vld [vmem:[%s1855_s24 + $0x18] sm:$0xff]  ;;  %v170_v6 = vld [vmem:[%s1855_s24 + $0x8] sm:$0xff] }
  0x17   : > { %235 = vperm.xlu0 %1684, %v169_v3   ;;  %v177_v7 = vld [vmem:[%s1855_s24 + $0x40] sm:$0xff]  ;;  %v176_v8 = vld [vmem:[%s1855_s24 + $0x38] sm:$0xff]  ;;  %v175_v9 = vld [vmem:[%s1855_s24 + $0x30] sm:$0xff] }
  0x18   : > { %v180_v10 = vld [vmem:[%s1855_s24 + $0x58] sm:$0xff]  ;;  %v179_v11 = vld [vmem:[%s1855_s24 + $0x50] sm:$0xff]  ;;  %v178_v12 = vld [vmem:[%s1855_s24 + $0x48] sm:$0xff] }
  0x19   : > { %v183_v13 = vld [vmem:[%s1855_s24 + $0x70] sm:$0xff]  ;;  %v182_v14 = vld [vmem:[%s1855_s24 + $0x68] sm:$0xff]  ;;  %v181_v15 = vld [vmem:[%s1855_s24 + $0x60] sm:$0xff] }
  0x1a   : > { %v186_v16 = vld [vmem:[%s1855_s24 + $0x88] sm:$0xff]  ;;  %v185_v17 = vld [vmem:[%s1855_s24 + $0x80] sm:$0xff]  ;;  %v184_v18 = vld [vmem:[%s1855_s24 + $0x78] sm:$0xff] }
  0x1b   : > { %v189_v19 = vld [vmem:[%s1855_s24 + $0xa0] sm:$0xff]  ;;  %v188_v20 = vld [vmem:[%s1855_s24 + $0x98] sm:$0xff]  ;;  %v187_v21 = vld [vmem:[%s1855_s24 + $0x90] sm:$0xff] }
  0x1c   : > { %v192_v22 = vld [vmem:[%s1855_s24 + $0xb8] sm:$0xff]  ;;  %v191_v23 = vld [vmem:[%s1855_s24 + $0xb0] sm:$0xff]  ;;  %v190_v24 = vld [vmem:[%s1855_s24 + $0xa8] sm:$0xff] }
  0x1d   : > { %v195_v25 = vld [vmem:[%s1855_s24 + $0xd0] sm:$0xff]  ;;  %v194_v26 = vld [vmem:[%s1855_s24 + $0xc8] sm:$0xff]  ;;  %v193_v27 = vld [vmem:[%s1855_s24 + $0xc0] sm:$0xff] }
  0x1e   : > { %260 = vperm.xlu2 %1686, %v174_v4   ;;  %250 = vperm.xlu1 %1685, %v172_v5   ;;  %v198_v28 = vld [vmem:[%s1855_s24 + $0xe8] sm:$0xff]  ;;  %v197_v29 = vld [vmem:[%s1855_s24 + $0xe0] sm:$0xff]  ;;  %v196_v30 = vld [vmem:[%s1855_s24 + $0xd8] sm:$0xff] }
  0x1f   : > { %240 = vperm.xlu0 %1684, %v170_v6   ;;  %v201_v31 = vld [vmem:[%s1855_s24 + $0x100] sm:$0xff]  ;;  %v200_v32 = vld [vmem:[%s1855_s24 + $0xf8] sm:$0xff]  ;;  %v199_v33 = vld [vmem:[%s1855_s24 + $0xf0] sm:$0xff] }
  0x20   : > { %v204_v34 = vld [vmem:[%s1855_s24 + $0x118] sm:$0xff]  ;;  %v203_v35 = vld [vmem:[%s1855_s24 + $0x110] sm:$0xff]  ;;  %v202_v36 = vld [vmem:[%s1855_s24 + $0x108] sm:$0xff] }
  0x21   : > { %v207_v38 = vld [vmem:[%s1855_s24 + $0x130] sm:$0xff]  ;;  %v206_v39 = vld [vmem:[%s1855_s24 + $0x128] sm:$0xff]  ;;  %v205_v40 = vld [vmem:[%s1855_s24 + $0x120] sm:$0xff] }
  0x22   : > { %v210_v42 = vld [vmem:[%s1855_s24 + $0x148] sm:$0xff]  ;;  %v209_v43 = vld [vmem:[%s1855_s24 + $0x140] sm:$0xff]  ;;  %v208_v44 = vld [vmem:[%s1855_s24 + $0x138] sm:$0xff] }
  0x23   : > { %v213_v46 = vld [vmem:[%s1855_s24 + $0x160] sm:$0xff]  ;;  %v212_v47 = vld [vmem:[%s1855_s24 + $0x158] sm:$0xff]  ;;  %v211_v48 = vld [vmem:[%s1855_s24 + $0x150] sm:$0xff] }
  0x24   : > { %v216_v52 = vld [vmem:[%s1855_s24 + $0x178] sm:$0xff]  ;;  %v215_v53 = vld [vmem:[%s1855_s24 + $0x170] sm:$0xff]  ;;  %v214_v54 = vld [vmem:[%s1855_s24 + $0x168] sm:$0xff] }
  0x25   : > { %v219_v58 = vld [vmem:[%s1855_s24 + $0x190] sm:$0xff]  ;;  %v218_v59 = vld [vmem:[%s1855_s24 + $0x188] sm:$0xff]  ;;  %v217_v60 = vld [vmem:[%s1855_s24 + $0x180] sm:$0xff] }
  0x26   : > { %275 = vperm.xlu2 %1686, %v177_v7   ;;  %270 = vperm.xlu1 %1685, %v176_v8   ;;  %v222_v0 = vld [vmem:[%s1855_s24 + $0x1a8] sm:$0xff]  ;;  %v221_v1 = vld [vmem:[%s1855_s24 + $0x1a0] sm:$0xff]  ;;  %v220_v2 = vld [vmem:[%s1855_s24 + $0x198] sm:$0xff] }
  0x27   : > { %265 = vperm.xlu0 %1684, %v175_v9   ;;  %v225_v6 = vld [vmem:[%s1855_s24 + $0x1c0] sm:$0xff]  ;;  %v224_v7 = vld [vmem:[%s1855_s24 + $0x1b8] sm:$0xff]  ;;  %v223_v8 = vld [vmem:[%s1855_s24 + $0x1b0] sm:$0xff] }
  0x2e   : > { %290 = vperm.xlu2 %1686, %v180_v10   ;;  %285 = vperm.xlu1 %1685, %v179_v11  }
  0x2f   : > { %280 = vperm.xlu0 %1684, %v178_v12   ;;  %v228_v12 = vld [vmem:[%s1855_s24 + $0x1d8] sm:$0xff] }
  0x36   : > { %305 = vperm.xlu2 %1686, %v183_v13   ;;  %300 = vperm.xlu1 %1685, %v182_v14   ;;  %v227_v13 = vld [vmem:[%s1855_s24 + $0x1d0] sm:$0xff]  ;;  %v226_v14 = vld [vmem:[%s1855_s24 + $0x1c8] sm:$0xff] }
  0x37   : > { %295 = vperm.xlu0 %1684, %v181_v15  }
  0x3e   : > { %320 = vperm.xlu2 %1686, %v186_v16   ;;  %315 = vperm.xlu1 %1685, %v185_v17  }
  0x3f   : > { %310 = vperm.xlu0 %1684, %v184_v18   ;;  %v231_v18 = vld [vmem:[%s1855_s24 + $0x1f0] sm:$0xff] }
  0x46   : > { %335 = vperm.xlu2 %1686, %v189_v19   ;;  %330 = vperm.xlu1 %1685, %v188_v20   ;;  %v230_v19 = vld [vmem:[%s1855_s24 + $0x1e8] sm:$0xff]  ;;  %v229_v20 = vld [vmem:[%s1855_s24 + $0x1e0] sm:$0xff] }
  0x47   : > { %325 = vperm.xlu0 %1684, %v187_v21  }
  0x4e   : > { %350 = vperm.xlu2 %1686, %v192_v22   ;;  %345 = vperm.xlu1 %1685, %v191_v23  }
  0x4f   : > { %340 = vperm.xlu0 %1684, %v190_v24   ;;  %v232_v24 = vld [vmem:[%s1855_s24 + $0x1f8] sm:$0xff] }
  0x56   : > { %365 = vperm.xlu2 %1686, %v195_v25   ;;  %360 = vperm.xlu1 %1685, %v194_v26  }
  0x57   : > { %355 = vperm.xlu0 %1684, %v193_v27  }
  0x5e   : > { %380 = vperm.xlu2 %1686, %v198_v28   ;;  %375 = vperm.xlu1 %1685, %v197_v29  }
  0x5f   : > { %370 = vperm.xlu0 %1684, %v196_v30  }
  0x66   : > { %395 = vperm.xlu2 %1686, %v201_v31   ;;  %390 = vperm.xlu1 %1685, %v200_v32  }
  0x67   : > { %385 = vperm.xlu0 %1684, %v199_v33  }
  0x6e   : > { %410 = vperm.xlu2 %1686, %v204_v34   ;;  %405 = vperm.xlu1 %1685, %v203_v35  }
  0x6f   : > { %400 = vperm.xlu0 %1684, %v202_v36  }
  0x70   : > { %v256_v37 = vpop.permute.xlu2 %255 }
  0x71   : > { %558 = vst.msk [vmem:[%s1894_s27 + $0x20] sm:$0xff] %vm553_vm0, %v256_v37 }
  0x76   : > { %425 = vperm.xlu2 %1686, %v207_v38   ;;  %420 = vperm.xlu1 %1685, %v206_v39  }
  0x77   : > { %415 = vperm.xlu0 %1684, %v205_v40  }
  0x78   : > { %v261_v41 = vpop.permute.xlu2 %260 }
  0x79   : > { %559 = vst.msk [vmem:[%s1894_s27 + $0x28] sm:$0xff] %vm553_vm0, %v261_v41 }
  0x7e   : > { %440 = vperm.xlu2 %1686, %v210_v42   ;;  %435 = vperm.xlu1 %1685, %v209_v43  }
  0x7f   : > { %430 = vperm.xlu0 %1684, %v208_v44  }
  0x80   : > { %v276_v45 = vpop.permute.xlu2 %275 }
  0x81   : > { %562 = vst.msk [vmem:[%s1894_s27 + $0x40] sm:$0xff] %vm553_vm0, %v276_v45 }
  0x86   : > { %455 = vperm.xlu2 %1686, %v213_v46   ;;  %450 = vperm.xlu1 %1685, %v212_v47  }
  0x87   : > { %445 = vperm.xlu0 %1684, %v211_v48  }
  0x88   : > { %v291_v49 = vpop.permute.xlu2 %290  ;;  %v246_v50 = vpop.permute.xlu1 %245 }
  0x89   : > { %565 = vst.msk [vmem:[%s1894_s27 + $0x58] sm:$0xff] %vm553_vm0, %v291_v49  ;;  %v236_v51 = vpop.permute.xlu0 %235 }
  0x8a   : > { %556 = vst.msk [vmem:[%s1894_s27 + $0x10] sm:$0xff] %vm553_vm0, %v246_v50 }
  0x8b   : > { %554 = vst.msk [vmem:[%s1894_s27] sm:$0xff] %vm553_vm0, %v236_v51 }
  0x8e   : > { %470 = vperm.xlu2 %1686, %v216_v52   ;;  %465 = vperm.xlu1 %1685, %v215_v53  }
  0x8f   : > { %460 = vperm.xlu0 %1684, %v214_v54  }
  0x90   : > { %v306_v55 = vpop.permute.xlu2 %305  ;;  %v251_v56 = vpop.permute.xlu1 %250 }
  0x91   : > { %568 = vst.msk [vmem:[%s1894_s27 + $0x70] sm:$0xff] %vm553_vm0, %v306_v55  ;;  %v241_v57 = vpop.permute.xlu0 %240 }
  0x92   : > { %557 = vst.msk [vmem:[%s1894_s27 + $0x18] sm:$0xff] %vm553_vm0, %v251_v56 }
  0x93   : > { %555 = vst.msk [vmem:[%s1894_s27 + $0x8] sm:$0xff] %vm553_vm0, %v241_v57 }
  0x96   : > { %485 = vperm.xlu2 %1686, %v219_v58   ;;  %480 = vperm.xlu1 %1685, %v218_v59  }
  0x97   : > { %475 = vperm.xlu0 %1684, %v217_v60  }
  0x98   : > { %v321_v61 = vpop.permute.xlu2 %320  ;;  %v271_v62 = vpop.permute.xlu1 %270 }
  0x99   : > { %571 = vst.msk [vmem:[%s1894_s27 + $0x88] sm:$0xff] %vm553_vm0, %v321_v61  ;;  %v266_v63 = vpop.permute.xlu0 %265 }
  0x9a   : > { %561 = vst.msk [vmem:[%s1894_s27 + $0x38] sm:$0xff] %vm553_vm0, %v271_v62  ;;  %v1687_v62 = vld [vmem:[%s2652_s1] ss:$0 sm:$0xff] }
  0x9b   : > { %560 = vst.msk [vmem:[%s1894_s27 + $0x30] sm:$0xff] %vm553_vm0, %v266_v63  ;;  %v1688_v63 = vld [vmem:[%s2652_s1 + $0x1] ss:$0 sm:$0xff] }
  0x9c   : > { %1574 = vst.msk [vmem:[%s1894_s27 + $0x200] sm:$0xff] %vm553_vm0, %v1687_v62  ;;  %v1748_v62 = vld [vmem:[%s2652_s1 + $0x3d] ss:$0 sm:$0xff] }
  0x9d   : > { %1575 = vst.msk [vmem:[%s1894_s27 + $0x208] sm:$0xff] %vm553_vm0, %v1688_v63  ;;  %v1749_v63 = vld [vmem:[%s2652_s1 + $0x3e] ss:$0 sm:$0xff] }
  0x9e   : > { %500 = vperm.xlu2 %1686, %v222_v0   ;;  %495 = vperm.xlu1 %1685, %v221_v1   ;;  %v1689_v1 = vld [vmem:[%s2652_s1 + $0x2] ss:$0 sm:$0xff]  ;;  %1635 = vst.msk [vmem:[%s1894_s27 + $0x3e8] sm:$0xff] %vm553_vm0, %v1748_v62 }
  0x9f   : > { %490 = vperm.xlu0 %1684, %v220_v2   ;;  %1576 = vst.msk [vmem:[%s1894_s27 + $0x210] sm:$0xff] %vm553_vm0, %v1689_v1  ;;  %v1231_v1 = vld [vmem:[%s1894_s27] sm:$0xff] (%p1839_p3) }
  0xa0   : > { %v336_v3 = vpop.permute.xlu2 %335  ;;  %v286_v4 = vpop.permute.xlu1 %285  ;;  %1636 = vst.msk [vmem:[%s1894_s27 + $0x3f0] sm:$0xff] %vm553_vm0, %v1749_v63 }
  0xa1   : > { %574 = vst.msk [vmem:[%s1894_s27 + $0xa0] sm:$0xff] %vm553_vm0, %v336_v3  ;;  %v281_v5 = vpop.permute.xlu0 %280  ;;  %v1690_v3 = vld [vmem:[%s2652_s1 + $0x3] ss:$0 sm:$0xff] }
  0xa2   : > { %564 = vst.msk [vmem:[%s1894_s27 + $0x50] sm:$0xff] %vm553_vm0, %v286_v4  ;;  %v1691_v4 = vld [vmem:[%s2652_s1 + $0x4] ss:$0 sm:$0xff] }
  0xa3   : > { %563 = vst.msk [vmem:[%s1894_s27 + $0x48] sm:$0xff] %vm553_vm0, %v281_v5  ;;  %v1692_v5 = vld [vmem:[%s2652_s1 + $0x5] ss:$0 sm:$0xff] }
  0xa4   : > { %1577 = vst.msk [vmem:[%s1894_s27 + $0x218] sm:$0xff] %vm553_vm0, %v1690_v3  ;;  %v1235_v3 = vld [vmem:[%s1894_s27 + $0x10] sm:$0xff] (%p1839_p3) }
  0xa5   : > { %1578 = vst.msk [vmem:[%s1894_s27 + $0x220] sm:$0xff] %vm553_vm0, %v1691_v4  ;;  %v1237_v4 = vld [vmem:[%s1894_s27 + $0x18] sm:$0xff] (%p1839_p3) }
  0xa6   : > { %515 = vperm.xlu2 %1686, %v225_v6   ;;  %510 = vperm.xlu1 %1685, %v224_v7   ;;  %v1693_v6 = vld [vmem:[%s2652_s1 + $0x6] ss:$0 sm:$0xff]  ;;  %v1694_v7 = vld [vmem:[%s2652_s1 + $0x7] ss:$0 sm:$0xff]  ;;  %1579 = vst.msk [vmem:[%s1894_s27 + $0x228] sm:$0xff] %vm553_vm0, %v1692_v5 }
  0xa7   : > { %505 = vperm.xlu0 %1684, %v223_v8   ;;  %v1695_v8 = vld [vmem:[%s2652_s1 + $0x8] ss:$0 sm:$0xff]  ;;  %1580 = vst.msk [vmem:[%s1894_s27 + $0x230] sm:$0xff] %vm553_vm0, %v1693_v6  ;;  %v1239_v5 = vld [vmem:[%s1894_s27 + $0x20] sm:$0xff] (%p1839_p3) }
  0xa8   : > { %v351_v9 = vpop.permute.xlu2 %350  ;;  %v301_v10 = vpop.permute.xlu1 %300  ;;  %1581 = vst.msk [vmem:[%s1894_s27 + $0x238] sm:$0xff] %vm553_vm0, %v1694_v7  ;;  %v1241_v6 = vld [vmem:[%s1894_s27 + $0x28] sm:$0xff] (%p1839_p3)  ;;  %v1243_v7 = vld [vmem:[%s1894_s27 + $0x30] sm:$0xff] (%p1839_p3) }
  0xa9   : > { %577 = vst.msk [vmem:[%s1894_s27 + $0xb8] sm:$0xff] %vm553_vm0, %v351_v9  ;;  %v296_v11 = vpop.permute.xlu0 %295  ;;  %v1696_v9 = vld [vmem:[%s2652_s1 + $0x9] ss:$0 sm:$0xff] }
  0xaa   : > { %567 = vst.msk [vmem:[%s1894_s27 + $0x68] sm:$0xff] %vm553_vm0, %v301_v10 }
  0xab   : > { %566 = vst.msk [vmem:[%s1894_s27 + $0x60] sm:$0xff] %vm553_vm0, %v296_v11  ;;  %v1697_v11 = vld [vmem:[%s2652_s1 + $0xa] ss:$0 sm:$0xff] }
  0xac   : > { %1582 = vst.msk [vmem:[%s1894_s27 + $0x240] sm:$0xff] %vm553_vm0, %v1695_v8  ;;  %v1245_v8 = vld [vmem:[%s1894_s27 + $0x38] sm:$0xff] (%p1839_p3) }
  0xad   : > { %1583 = vst.msk [vmem:[%s1894_s27 + $0x248] sm:$0xff] %vm553_vm0, %v1696_v9  ;;  %v1247_v9 = vld [vmem:[%s1894_s27 + $0x40] sm:$0xff] (%p1839_p3) }
  0xae   : > { %530 = vperm.xlu2 %1686, %v228_v12   ;;  %525 = vperm.xlu1 %1685, %v227_v13   ;;  %v1698_v12 = vld [vmem:[%s2652_s1 + $0xb] ss:$0 sm:$0xff]  ;;  %v1699_v13 = vld [vmem:[%s2652_s1 + $0xc] ss:$0 sm:$0xff]  ;;  %1584 = vst.msk [vmem:[%s1894_s27 + $0x250] sm:$0xff] %vm553_vm0, %v1697_v11  ;;  %v1251_v11 = vld [vmem:[%s1894_s27 + $0x50] sm:$0xff] (%p1839_p3) }
  0xaf   : > { %520 = vperm.xlu0 %1684, %v226_v14   ;;  %v1700_v14 = vld [vmem:[%s2652_s1 + $0xd] ss:$0 sm:$0xff]  ;;  %1585 = vst.msk [vmem:[%s1894_s27 + $0x258] sm:$0xff] %vm553_vm0, %v1698_v12  ;;  %v1253_v12 = vld [vmem:[%s1894_s27 + $0x58] sm:$0xff] (%p1839_p3) }
  0xb0   : > { %v366_v15 = vpop.permute.xlu2 %365  ;;  %v316_v16 = vpop.permute.xlu1 %315  ;;  %1586 = vst.msk [vmem:[%s1894_s27 + $0x260] sm:$0xff] %vm553_vm0, %v1699_v13 }
  0xb1   : > { %580 = vst.msk [vmem:[%s1894_s27 + $0xd0] sm:$0xff] %vm553_vm0, %v366_v15  ;;  %v311_v17 = vpop.permute.xlu0 %310  ;;  %v1701_v15 = vld [vmem:[%s2652_s1 + $0xe] ss:$0 sm:$0xff] }
  0xb2   : > { %570 = vst.msk [vmem:[%s1894_s27 + $0x80] sm:$0xff] %vm553_vm0, %v316_v16  ;;  %v1702_v16 = vld [vmem:[%s2652_s1 + $0xf] ss:$0 sm:$0xff]  ;;  %v1255_v13 = vld [vmem:[%s1894_s27 + $0x60] sm:$0xff] (%p1839_p3) }
  0xb3   : > { %569 = vst.msk [vmem:[%s1894_s27 + $0x78] sm:$0xff] %vm553_vm0, %v311_v17  ;;  %v1703_v17 = vld [vmem:[%s2652_s1 + $0x10] ss:$0 sm:$0xff] }
  0xb4   : > { %1587 = vst.msk [vmem:[%s1894_s27 + $0x268] sm:$0xff] %vm553_vm0, %v1700_v14  ;;  %v1257_v14 = vld [vmem:[%s1894_s27 + $0x68] sm:$0xff] (%p1839_p3) }
  0xb5   : > { %1588 = vst.msk [vmem:[%s1894_s27 + $0x270] sm:$0xff] %vm553_vm0, %v1701_v15  ;;  %v1259_v15 = vld [vmem:[%s1894_s27 + $0x70] sm:$0xff] (%p1839_p3) }
  0xb6   : > { %545 = vperm.xlu2 %1686, %v231_v18   ;;  %540 = vperm.xlu1 %1685, %v230_v19   ;;  %v1704_v18 = vld [vmem:[%s2652_s1 + $0x11] ss:$0 sm:$0xff]  ;;  %v1705_v19 = vld [vmem:[%s2652_s1 + $0x12] ss:$0 sm:$0xff]  ;;  %1589 = vst.msk [vmem:[%s1894_s27 + $0x278] sm:$0xff] %vm553_vm0, %v1702_v16 }
  0xb7   : > { %535 = vperm.xlu0 %1684, %v229_v20   ;;  %v1706_v20 = vld [vmem:[%s2652_s1 + $0x13] ss:$0 sm:$0xff]  ;;  %1590 = vst.msk [vmem:[%s1894_s27 + $0x280] sm:$0xff] %vm553_vm0, %v1703_v17 }
  0xb8   : > { %v381_v21 = vpop.permute.xlu2 %380  ;;  %v331_v22 = vpop.permute.xlu1 %330  ;;  %1591 = vst.msk [vmem:[%s1894_s27 + $0x288] sm:$0xff] %vm553_vm0, %v1704_v18  ;;  %v1265_v18 = vld [vmem:[%s1894_s27 + $0x88] sm:$0xff] (%p1839_p3) }
  0xb9   : > { %583 = vst.msk [vmem:[%s1894_s27 + $0xe8] sm:$0xff] %vm553_vm0, %v381_v21  ;;  %v326_v23 = vpop.permute.xlu0 %325  ;;  %v1707_v21 = vld [vmem:[%s2652_s1 + $0x14] ss:$0 sm:$0xff]  ;;  %v1263_v17 = vld [vmem:[%s1894_s27 + $0x80] sm:$0xff] (%p1839_p3) }
  0xba   : > { %573 = vst.msk [vmem:[%s1894_s27 + $0x98] sm:$0xff] %vm553_vm0, %v331_v22  ;;  %v1708_v22 = vld [vmem:[%s2652_s1 + $0x15] ss:$0 sm:$0xff]  ;;  %v1261_v16 = vld [vmem:[%s1894_s27 + $0x78] sm:$0xff] (%p1839_p3) }
  0xbb   : > { %572 = vst.msk [vmem:[%s1894_s27 + $0x90] sm:$0xff] %vm553_vm0, %v326_v23  ;;  %v1709_v23 = vld [vmem:[%s2652_s1 + $0x16] ss:$0 sm:$0xff] }
  0xbc   : > { %1592 = vst.msk [vmem:[%s1894_s27 + $0x290] sm:$0xff] %vm553_vm0, %v1705_v19 }
  0xbd   : > { %1593 = vst.msk [vmem:[%s1894_s27 + $0x298] sm:$0xff] %vm553_vm0, %v1706_v20 }
  0xbe   : > { %1594 = vst.msk [vmem:[%s1894_s27 + $0x2a0] sm:$0xff] %vm553_vm0, %v1707_v21  ;;  %v1271_v21 = vld [vmem:[%s1894_s27 + $0xa0] sm:$0xff] (%p1839_p3) }
  0xbf   : > { %550 = vperm.xlu0 %1684, %v232_v24   ;;  %v1710_v24 = vld [vmem:[%s2652_s1 + $0x17] ss:$0 sm:$0xff]  ;;  %1595 = vst.msk [vmem:[%s1894_s27 + $0x2a8] sm:$0xff] %vm553_vm0, %v1708_v22 }
  0xc0   : > { %v396_v25 = vpop.permute.xlu2 %395  ;;  %v346_v26 = vpop.permute.xlu1 %345  ;;  %1596 = vst.msk [vmem:[%s1894_s27 + $0x2b0] sm:$0xff] %vm553_vm0, %v1709_v23 }
  0xc1   : > { %586 = vst.msk [vmem:[%s1894_s27 + $0x100] sm:$0xff] %vm553_vm0, %v396_v25  ;;  %v341_v27 = vpop.permute.xlu0 %340  ;;  %v1711_v25 = vld [vmem:[%s2652_s1 + $0x18] ss:$0 sm:$0xff] }
  0xc2   : > { %576 = vst.msk [vmem:[%s1894_s27 + $0xb0] sm:$0xff] %vm553_vm0, %v346_v26  ;;  %v1712_v26 = vld [vmem:[%s2652_s1 + $0x19] ss:$0 sm:$0xff]  ;;  %v1267_v19 = vld [vmem:[%s1894_s27 + $0x90] sm:$0xff] (%p1839_p3) }
  0xc3   : > { %575 = vst.msk [vmem:[%s1894_s27 + $0xa8] sm:$0xff] %vm553_vm0, %v341_v27  ;;  %v1713_v27 = vld [vmem:[%s2652_s1 + $0x1a] ss:$0 sm:$0xff] }
  0xc4   : > { %1597 = vst.msk [vmem:[%s1894_s27 + $0x2b8] sm:$0xff] %vm553_vm0, %v1710_v24  ;;  %v1269_v20 = vld [vmem:[%s1894_s27 + $0x98] sm:$0xff] (%p1839_p3) }
  0xc5   : > { %1598 = vst.msk [vmem:[%s1894_s27 + $0x2c0] sm:$0xff] %vm553_vm0, %v1711_v25  ;;  %v1277_v24 = vld [vmem:[%s1894_s27 + $0xb8] sm:$0xff] (%p1839_p3) }
  0xc6   : > { %1599 = vst.msk [vmem:[%s1894_s27 + $0x2c8] sm:$0xff] %vm553_vm0, %v1712_v26 }
  0xc7   : > { %1600 = vst.msk [vmem:[%s1894_s27 + $0x2d0] sm:$0xff] %vm553_vm0, %v1713_v27  ;;  %v1283_v27 = vld [vmem:[%s1894_s27 + $0xd0] sm:$0xff] (%p1839_p3) }
  0xc8   : > { %v411_v28 = vpop.permute.xlu2 %410  ;;  %v361_v29 = vpop.permute.xlu1 %360  ;;  %1232 = vst [vmem:[%s2380_s16] sm:$0xff] (%p1839_p3), %v1231_v1  ;;  %v1359_v1 = vld [vmem:[%s1894_s27 + $0x200] sm:$0xff] (%p1839_p3) }
  0xc9   : > { %589 = vst.msk [vmem:[%s1894_s27 + $0x118] sm:$0xff] %vm553_vm0, %v411_v28  ;;  %v356_v30 = vpop.permute.xlu0 %355  ;;  %v1714_v28 = vld [vmem:[%s2652_s1 + $0x1b] ss:$0 sm:$0xff]  ;;  %v1275_v23 = vld [vmem:[%s1894_s27 + $0xb0] sm:$0xff] (%p1839_p3) }
  0xca   : > { %579 = vst.msk [vmem:[%s1894_s27 + $0xc8] sm:$0xff] %vm553_vm0, %v361_v29  ;;  %v1715_v29 = vld [vmem:[%s2652_s1 + $0x1c] ss:$0 sm:$0xff]  ;;  %v1273_v22 = vld [vmem:[%s1894_s27 + $0xa8] sm:$0xff] (%p1839_p3) }
  0xcb   : > { %578 = vst.msk [vmem:[%s1894_s27 + $0xc0] sm:$0xff] %vm553_vm0, %v356_v30  ;;  %v1716_v30 = vld [vmem:[%s2652_s1 + $0x1d] ss:$0 sm:$0xff] }
  0xcc   : > { %1601 = vst.msk [vmem:[%s1894_s27 + $0x2d8] sm:$0xff] %vm553_vm0, %v1714_v28 }
  0xcd   : > { %1602 = vst.msk [vmem:[%s1894_s27 + $0x2e0] sm:$0xff] %vm553_vm0, %v1715_v29 }
  0xce   : > { %1603 = vst.msk [vmem:[%s1894_s27 + $0x2e8] sm:$0xff] %vm553_vm0, %v1716_v30  ;;  %v1289_v30 = vld [vmem:[%s1894_s27 + $0xe8] sm:$0xff] (%p1839_p3) }
  0xcf   : > { %1236 = vst [vmem:[%s2380_s16 + $0x20] sm:$0xff] (%p1839_p3), %v1235_v3  ;;  %v1363_v3 = vld [vmem:[%s1894_s27 + $0x210] sm:$0xff] (%p1839_p3) }
  0xd0   : > { %v426_v31 = vpop.permute.xlu2 %425  ;;  %v376_v32 = vpop.permute.xlu1 %375  ;;  %1238 = vst [vmem:[%s2380_s16 + $0x30] sm:$0xff] (%p1839_p3), %v1237_v4  ;;  %v1365_v4 = vld [vmem:[%s1894_s27 + $0x218] sm:$0xff] (%p1839_p3) }
  0xd1   : > { %592 = vst.msk [vmem:[%s1894_s27 + $0x130] sm:$0xff] %vm553_vm0, %v426_v31  ;;  %v371_v33 = vpop.permute.xlu0 %370  ;;  %v1717_v31 = vld [vmem:[%s2652_s1 + $0x1e] ss:$0 sm:$0xff]  ;;  %v1281_v26 = vld [vmem:[%s1894_s27 + $0xc8] sm:$0xff] (%p1839_p3) }
  0xd2   : > { %582 = vst.msk [vmem:[%s1894_s27 + $0xe0] sm:$0xff] %vm553_vm0, %v376_v32  ;;  %v1718_v32 = vld [vmem:[%s2652_s1 + $0x1f] ss:$0 sm:$0xff]  ;;  %v1279_v25 = vld [vmem:[%s1894_s27 + $0xc0] sm:$0xff] (%p1839_p3) }
  0xd3   : > { %581 = vst.msk [vmem:[%s1894_s27 + $0xd8] sm:$0xff] %vm553_vm0, %v371_v33  ;;  %v1719_v33 = vld [vmem:[%s2652_s1 + $0x20] ss:$0 sm:$0xff] }
  0xd4   : > { %1604 = vst.msk [vmem:[%s1894_s27 + $0x2f0] sm:$0xff] %vm553_vm0, %v1717_v31 }
  0xd5   : > { %1605 = vst.msk [vmem:[%s1894_s27 + $0x2f8] sm:$0xff] %vm553_vm0, %v1718_v32 }
  0xd6   : > { %1606 = vst.msk [vmem:[%s1894_s27 + $0x300] sm:$0xff] %vm553_vm0, %v1719_v33  ;;  %v1295_v33 = vld [vmem:[%s1894_s27 + $0x100] sm:$0xff] (%p1839_p3) }
  0xd7   : > { %1240 = vst [vmem:[%s2380_s16 + $0x40] sm:$0xff] (%p1839_p3), %v1239_v5  ;;  %v1367_v5 = vld [vmem:[%s1894_s27 + $0x220] sm:$0xff] (%p1839_p3) }
  0xd8   : > { %v441_v34 = vpop.permute.xlu2 %440  ;;  %v391_v35 = vpop.permute.xlu1 %390  ;;  %1242 = vst [vmem:[%s2380_s16 + $0x50] sm:$0xff] (%p1839_p3), %v1241_v6  ;;  %v1369_v6 = vld [vmem:[%s1894_s27 + $0x228] sm:$0xff] (%p1839_p3) }
  0xd9   : > { %595 = vst.msk [vmem:[%s1894_s27 + $0x148] sm:$0xff] %vm553_vm0, %v441_v34  ;;  %v386_v36 = vpop.permute.xlu0 %385  ;;  %v1720_v34 = vld [vmem:[%s2652_s1 + $0x21] ss:$0 sm:$0xff] }
  0xda   : > { %585 = vst.msk [vmem:[%s1894_s27 + $0xf8] sm:$0xff] %vm553_vm0, %v391_v35  ;;  %v1721_v35 = vld [vmem:[%s2652_s1 + $0x22] ss:$0 sm:$0xff]  ;;  %v1285_v28 = vld [vmem:[%s1894_s27 + $0xd8] sm:$0xff] (%p1839_p3) }
  0xdb   : > { %584 = vst.msk [vmem:[%s1894_s27 + $0xf0] sm:$0xff] %vm553_vm0, %v386_v36  ;;  %v1722_v36 = vld [vmem:[%s2652_s1 + $0x23] ss:$0 sm:$0xff] }
  0xdc   : > { %1607 = vst.msk [vmem:[%s1894_s27 + $0x308] sm:$0xff] %vm553_vm0, %v1720_v34  ;;  %v1287_v29 = vld [vmem:[%s1894_s27 + $0xe0] sm:$0xff] (%p1839_p3) }
  0xdd   : > { %1608 = vst.msk [vmem:[%s1894_s27 + $0x310] sm:$0xff] %vm553_vm0, %v1721_v35 }
  0xde   : > { %1609 = vst.msk [vmem:[%s1894_s27 + $0x318] sm:$0xff] %vm553_vm0, %v1722_v36  ;;  %v1301_v36 = vld [vmem:[%s1894_s27 + $0x118] sm:$0xff] (%p1839_p3) }
  0xdf   : > { %1244 = vst [vmem:[%s2380_s16 + $0x60] sm:$0xff] (%p1839_p3), %v1243_v7  ;;  %v1371_v7 = vld [vmem:[%s1894_s27 + $0x230] sm:$0xff] (%p1839_p3) }
  0xe0   : > { %v456_v37 = vpop.permute.xlu2 %455  ;;  %v406_v38 = vpop.permute.xlu1 %405  ;;  %1246 = vst [vmem:[%s2380_s16 + $0x70] sm:$0xff] (%p1839_p3), %v1245_v8  ;;  %v1373_v8 = vld [vmem:[%s1894_s27 + $0x238] sm:$0xff] (%p1839_p3) }
  0xe1   : > { %598 = vst.msk [vmem:[%s1894_s27 + $0x160] sm:$0xff] %vm553_vm0, %v456_v37  ;;  %v401_v39 = vpop.permute.xlu0 %400  ;;  %v1723_v37 = vld [vmem:[%s2652_s1 + $0x24] ss:$0 sm:$0xff]  ;;  %v1293_v32 = vld [vmem:[%s1894_s27 + $0xf8] sm:$0xff] (%p1839_p3) }
  0xe2   : > { %588 = vst.msk [vmem:[%s1894_s27 + $0x110] sm:$0xff] %vm553_vm0, %v406_v38  ;;  %v1724_v38 = vld [vmem:[%s2652_s1 + $0x25] ss:$0 sm:$0xff]  ;;  %v1291_v31 = vld [vmem:[%s1894_s27 + $0xf0] sm:$0xff] (%p1839_p3) }
  0xe3   : > { %587 = vst.msk [vmem:[%s1894_s27 + $0x108] sm:$0xff] %vm553_vm0, %v401_v39  ;;  %v1725_v39 = vld [vmem:[%s2652_s1 + $0x26] ss:$0 sm:$0xff] }
  0xe4   : > { %1610 = vst.msk [vmem:[%s1894_s27 + $0x320] sm:$0xff] %vm553_vm0, %v1723_v37 }
  0xe5   : > { %1611 = vst.msk [vmem:[%s1894_s27 + $0x328] sm:$0xff] %vm553_vm0, %v1724_v38 }
  0xe6   : > { %1612 = vst.msk [vmem:[%s1894_s27 + $0x330] sm:$0xff] %vm553_vm0, %v1725_v39  ;;  %v1307_v39 = vld [vmem:[%s1894_s27 + $0x130] sm:$0xff] (%p1839_p3) }
  0xe7   : > { %1248 = vst [vmem:[%s2380_s16 + $0x80] sm:$0xff] (%p1839_p3), %v1247_v9  ;;  %v1375_v9 = vld [vmem:[%s1894_s27 + $0x240] sm:$0xff] (%p1839_p3) }
  0xe8   : > { %v471_v40 = vpop.permute.xlu2 %470  ;;  %v421_v41 = vpop.permute.xlu1 %420  ;;  %1252 = vst [vmem:[%s2380_s16 + $0xa0] sm:$0xff] (%p1839_p3), %v1251_v11  ;;  %v1379_v11 = vld [vmem:[%s1894_s27 + $0x250] sm:$0xff] (%p1839_p3) }
  0xe9   : > { %601 = vst.msk [vmem:[%s1894_s27 + $0x178] sm:$0xff] %vm553_vm0, %v471_v40  ;;  %v416_v42 = vpop.permute.xlu0 %415  ;;  %v1726_v40 = vld [vmem:[%s2652_s1 + $0x27] ss:$0 sm:$0xff]  ;;  %v1299_v35 = vld [vmem:[%s1894_s27 + $0x110] sm:$0xff] (%p1839_p3) }
  0xea   : > { %591 = vst.msk [vmem:[%s1894_s27 + $0x128] sm:$0xff] %vm553_vm0, %v421_v41  ;;  %v1727_v41 = vld [vmem:[%s2652_s1 + $0x28] ss:$0 sm:$0xff] }
  0xeb   : > { %590 = vst.msk [vmem:[%s1894_s27 + $0x120] sm:$0xff] %vm553_vm0, %v416_v42  ;;  %v1728_v42 = vld [vmem:[%s2652_s1 + $0x29] ss:$0 sm:$0xff] }
  0xec   : > { %1613 = vst.msk [vmem:[%s1894_s27 + $0x338] sm:$0xff] %vm553_vm0, %v1726_v40  ;;  %v1297_v34 = vld [vmem:[%s1894_s27 + $0x108] sm:$0xff] (%p1839_p3) }
  0xed   : > { %1614 = vst.msk [vmem:[%s1894_s27 + $0x340] sm:$0xff] %vm553_vm0, %v1727_v41 }
  0xee   : > { %1615 = vst.msk [vmem:[%s1894_s27 + $0x348] sm:$0xff] %vm553_vm0, %v1728_v42  ;;  %v1313_v42 = vld [vmem:[%s1894_s27 + $0x148] sm:$0xff] (%p1839_p3) }
  0xef   : > { %1254 = vst [vmem:[%s2380_s16 + $0xb0] sm:$0xff] (%p1839_p3), %v1253_v12  ;;  %v1381_v12 = vld [vmem:[%s1894_s27 + $0x258] sm:$0xff] (%p1839_p3) }
  0xf0   : > { %v486_v43 = vpop.permute.xlu2 %485  ;;  %v436_v44 = vpop.permute.xlu1 %435  ;;  %1256 = vst [vmem:[%s2380_s16 + $0xc0] sm:$0xff] (%p1839_p3), %v1255_v13  ;;  %v1383_v13 = vld [vmem:[%s1894_s27 + $0x260] sm:$0xff] (%p1839_p3) }
  0xf1   : > { %604 = vst.msk [vmem:[%s1894_s27 + $0x190] sm:$0xff] %vm553_vm0, %v486_v43  ;;  %v431_v45 = vpop.permute.xlu0 %430  ;;  %v1729_v43 = vld [vmem:[%s2652_s1 + $0x2a] ss:$0 sm:$0xff] }
  0xf2   : > { %594 = vst.msk [vmem:[%s1894_s27 + $0x140] sm:$0xff] %vm553_vm0, %v436_v44  ;;  %v1730_v44 = vld [vmem:[%s2652_s1 + $0x2b] ss:$0 sm:$0xff]  ;;  %v1303_v37 = vld [vmem:[%s1894_s27 + $0x120] sm:$0xff] (%p1839_p3) }
  0xf3   : > { %593 = vst.msk [vmem:[%s1894_s27 + $0x138] sm:$0xff] %vm553_vm0, %v431_v45  ;;  %v1731_v45 = vld [vmem:[%s2652_s1 + $0x2c] ss:$0 sm:$0xff] }
  0xf4   : > { %1616 = vst.msk [vmem:[%s1894_s27 + $0x350] sm:$0xff] %vm553_vm0, %v1729_v43  ;;  %v1305_v38 = vld [vmem:[%s1894_s27 + $0x128] sm:$0xff] (%p1839_p3) }
  0xf5   : > { %1617 = vst.msk [vmem:[%s1894_s27 + $0x358] sm:$0xff] %vm553_vm0, %v1730_v44 }
  0xf6   : > { %1618 = vst.msk [vmem:[%s1894_s27 + $0x360] sm:$0xff] %vm553_vm0, %v1731_v45  ;;  %v1319_v45 = vld [vmem:[%s1894_s27 + $0x160] sm:$0xff] (%p1839_p3) }
  0xf7   : > { %1258 = vst [vmem:[%s2380_s16 + $0xd0] sm:$0xff] (%p1839_p3), %v1257_v14  ;;  %v1385_v14 = vld [vmem:[%s1894_s27 + $0x268] sm:$0xff] (%p1839_p3) }
  0xf8   : > { %v501_v46 = vpop.permute.xlu2 %500  ;;  %v451_v47 = vpop.permute.xlu1 %450  ;;  %1260 = vst [vmem:[%s2380_s16 + $0xe0] sm:$0xff] (%p1839_p3), %v1259_v15  ;;  %v1387_v15 = vld [vmem:[%s1894_s27 + $0x270] sm:$0xff] (%p1839_p3) }
  0xf9   : > { %607 = vst.msk [vmem:[%s1894_s27 + $0x1a8] sm:$0xff] %vm553_vm0, %v501_v46  ;;  %v446_v48 = vpop.permute.xlu0 %445  ;;  %v1732_v46 = vld [vmem:[%s2652_s1 + $0x2d] ss:$0 sm:$0xff]  ;;  %v1311_v41 = vld [vmem:[%s1894_s27 + $0x140] sm:$0xff] (%p1839_p3) }
  0xfa   : > { %597 = vst.msk [vmem:[%s1894_s27 + $0x158] sm:$0xff] %vm553_vm0, %v451_v47  ;;  %v1733_v47 = vld [vmem:[%s2652_s1 + $0x2e] ss:$0 sm:$0xff]  ;;  %v1309_v40 = vld [vmem:[%s1894_s27 + $0x138] sm:$0xff] (%p1839_p3) }
  0xfb   : > { %596 = vst.msk [vmem:[%s1894_s27 + $0x150] sm:$0xff] %vm553_vm0, %v446_v48  ;;  %v1734_v48 = vld [vmem:[%s2652_s1 + $0x2f] ss:$0 sm:$0xff] }
  0xfc   : > { %1619 = vst.msk [vmem:[%s1894_s27 + $0x368] sm:$0xff] %vm553_vm0, %v1732_v46 }
  0xfd   : > { %1620 = vst.msk [vmem:[%s1894_s27 + $0x370] sm:$0xff] %vm553_vm0, %v1733_v47 }
  0xfe   : > { %1621 = vst.msk [vmem:[%s1894_s27 + $0x378] sm:$0xff] %vm553_vm0, %v1734_v48  ;;  %v1325_v48 = vld [vmem:[%s1894_s27 + $0x178] sm:$0xff] (%p1839_p3) }
  0xff   : > { %1262 = vst [vmem:[%s2380_s16 + $0xf0] sm:$0xff] (%p1839_p3), %v1261_v16  ;;  %v1389_v16 = vld [vmem:[%s1894_s27 + $0x278] sm:$0xff] (%p1839_p3) }
 0x100   : > { %v516_v49 = vpop.permute.xlu2 %515  ;;  %v466_v50 = vpop.permute.xlu1 %465  ;;  %1264 = vst [vmem:[%s2380_s16 + $0x100] sm:$0xff] (%p1839_p3), %v1263_v17  ;;  %v1391_v17 = vld [vmem:[%s1894_s27 + $0x280] sm:$0xff] (%p1839_p3) }
 0x101   : > { %610 = vst.msk [vmem:[%s1894_s27 + $0x1c0] sm:$0xff] %vm553_vm0, %v516_v49  ;;  %v461_v51 = vpop.permute.xlu0 %460  ;;  %v1735_v49 = vld [vmem:[%s2652_s1 + $0x30] ss:$0 sm:$0xff]  ;;  %v1317_v44 = vld [vmem:[%s1894_s27 + $0x158] sm:$0xff] (%p1839_p3) }
 0x102   : > { %600 = vst.msk [vmem:[%s1894_s27 + $0x170] sm:$0xff] %vm553_vm0, %v466_v50  ;;  %v1736_v50 = vld [vmem:[%s2652_s1 + $0x31] ss:$0 sm:$0xff] }
 0x103   : > { %599 = vst.msk [vmem:[%s1894_s27 + $0x168] sm:$0xff] %vm553_vm0, %v461_v51  ;;  %v1737_v51 = vld [vmem:[%s2652_s1 + $0x32] ss:$0 sm:$0xff] }
 0x104   : > { %1622 = vst.msk [vmem:[%s1894_s27 + $0x380] sm:$0xff] %vm553_vm0, %v1735_v49  ;;  %v1315_v43 = vld [vmem:[%s1894_s27 + $0x150] sm:$0xff] (%p1839_p3) }
 0x105   : > { %1623 = vst.msk [vmem:[%s1894_s27 + $0x388] sm:$0xff] %vm553_vm0, %v1736_v50 }
 0x106   : > { %1624 = vst.msk [vmem:[%s1894_s27 + $0x390] sm:$0xff] %vm553_vm0, %v1737_v51  ;;  %v1331_v51 = vld [vmem:[%s1894_s27 + $0x190] sm:$0xff] (%p1839_p3) }
 0x107   : > { %1266 = vst [vmem:[%s2380_s16 + $0x110] sm:$0xff] (%p1839_p3), %v1265_v18  ;;  %v1393_v18 = vld [vmem:[%s1894_s27 + $0x288] sm:$0xff] (%p1839_p3) }
 0x108   : > { %v531_v52 = vpop.permute.xlu2 %530  ;;  %v481_v53 = vpop.permute.xlu1 %480  ;;  %1268 = vst [vmem:[%s2380_s16 + $0x120] sm:$0xff] (%p1839_p3), %v1267_v19  ;;  %v1395_v19 = vld [vmem:[%s1894_s27 + $0x290] sm:$0xff] (%p1839_p3) }
 0x109   : > { %613 = vst.msk [vmem:[%s1894_s27 + $0x1d8] sm:$0xff] %vm553_vm0, %v531_v52  ;;  %v476_v54 = vpop.permute.xlu0 %475  ;;  %v1738_v52 = vld [vmem:[%s2652_s1 + $0x33] ss:$0 sm:$0xff] }
 0x10a   : > { %603 = vst.msk [vmem:[%s1894_s27 + $0x188] sm:$0xff] %vm553_vm0, %v481_v53  ;;  %v1739_v53 = vld [vmem:[%s2652_s1 + $0x34] ss:$0 sm:$0xff]  ;;  %v1321_v46 = vld [vmem:[%s1894_s27 + $0x168] sm:$0xff] (%p1839_p3) }
 0x10b   : > { %602 = vst.msk [vmem:[%s1894_s27 + $0x180] sm:$0xff] %vm553_vm0, %v476_v54  ;;  %v1740_v54 = vld [vmem:[%s2652_s1 + $0x35] ss:$0 sm:$0xff] }
 0x10c   : > { %1625 = vst.msk [vmem:[%s1894_s27 + $0x398] sm:$0xff] %vm553_vm0, %v1738_v52  ;;  %v1323_v47 = vld [vmem:[%s1894_s27 + $0x170] sm:$0xff] (%p1839_p3) }
 0x10d   : > { %1626 = vst.msk [vmem:[%s1894_s27 + $0x3a0] sm:$0xff] %vm553_vm0, %v1739_v53 }
 0x10e   : > { %1627 = vst.msk [vmem:[%s1894_s27 + $0x3a8] sm:$0xff] %vm553_vm0, %v1740_v54  ;;  %v1337_v54 = vld [vmem:[%s1894_s27 + $0x1a8] sm:$0xff] (%p1839_p3) }
 0x10f   : > { %1270 = vst [vmem:[%s2380_s16 + $0x130] sm:$0xff] (%p1839_p3), %v1269_v20  ;;  %v1397_v20 = vld [vmem:[%s1894_s27 + $0x298] sm:$0xff] (%p1839_p3) }
 0x110   : > { %v546_v55 = vpop.permute.xlu2 %545  ;;  %v496_v56 = vpop.permute.xlu1 %495  ;;  %1272 = vst [vmem:[%s2380_s16 + $0x140] sm:$0xff] (%p1839_p3), %v1271_v21  ;;  %v1399_v21 = vld [vmem:[%s1894_s27 + $0x2a0] sm:$0xff] (%p1839_p3) }
 0x111   : > { %616 = vst.msk [vmem:[%s1894_s27 + $0x1f0] sm:$0xff] %vm553_vm0, %v546_v55  ;;  %v491_v57 = vpop.permute.xlu0 %490  ;;  %v1741_v55 = vld [vmem:[%s2652_s1 + $0x36] ss:$0 sm:$0xff]  ;;  %v1329_v50 = vld [vmem:[%s1894_s27 + $0x188] sm:$0xff] (%p1839_p3) }
 0x112   : > { %606 = vst.msk [vmem:[%s1894_s27 + $0x1a0] sm:$0xff] %vm553_vm0, %v496_v56  ;;  %v1742_v56 = vld [vmem:[%s2652_s1 + $0x37] ss:$0 sm:$0xff]  ;;  %v1327_v49 = vld [vmem:[%s1894_s27 + $0x180] sm:$0xff] (%p1839_p3) }
 0x113   : > { %605 = vst.msk [vmem:[%s1894_s27 + $0x198] sm:$0xff] %vm553_vm0, %v491_v57  ;;  %v1743_v57 = vld [vmem:[%s2652_s1 + $0x38] ss:$0 sm:$0xff] }
 0x114   : > { %1628 = vst.msk [vmem:[%s1894_s27 + $0x3b0] sm:$0xff] %vm553_vm0, %v1741_v55 }
 0x115   : > { %1629 = vst.msk [vmem:[%s1894_s27 + $0x3b8] sm:$0xff] %vm553_vm0, %v1742_v56 }
 0x116   : > { %1630 = vst.msk [vmem:[%s1894_s27 + $0x3c0] sm:$0xff] %vm553_vm0, %v1743_v57  ;;  %v1343_v57 = vld [vmem:[%s1894_s27 + $0x1c0] sm:$0xff] (%p1839_p3) }
 0x117   : > { %1274 = vst [vmem:[%s2380_s16 + $0x150] sm:$0xff] (%p1839_p3), %v1273_v22  ;;  %v1401_v22 = vld [vmem:[%s1894_s27 + $0x2a8] sm:$0xff] (%p1839_p3) }
 0x118   : > { %v511_v58 = vpop.permute.xlu1 %510  ;;  %1276 = vst [vmem:[%s2380_s16 + $0x160] sm:$0xff] (%p1839_p3), %v1275_v23  ;;  %v1355_v63 = vld [vmem:[%s1894_s27 + $0x1f0] sm:$0xff] (%p1839_p3) }
 0x119   : > { %609 = vst.msk [vmem:[%s1894_s27 + $0x1b8] sm:$0xff] %vm553_vm0, %v511_v58  ;;  %v506_v59 = vpop.permute.xlu0 %505  ;;  %v1744_v58 = vld [vmem:[%s2652_s1 + $0x39] ss:$0 sm:$0xff]  ;;  %v1335_v53 = vld [vmem:[%s1894_s27 + $0x1a0] sm:$0xff] (%p1839_p3)  ;;  %v1403_v23 = vld [vmem:[%s1894_s27 + $0x2b0] sm:$0xff] (%p1839_p3) }
 0x11a   : > { %608 = vst.msk [vmem:[%s1894_s27 + $0x1b0] sm:$0xff] %vm553_vm0, %v506_v59  ;;  %v1745_v59 = vld [vmem:[%s2652_s1 + $0x3a] ss:$0 sm:$0xff] }
 0x11b   : > { %1631 = vst.msk [vmem:[%s1894_s27 + $0x3c8] sm:$0xff] %vm553_vm0, %v1744_v58  ;;  %v1333_v52 = vld [vmem:[%s1894_s27 + $0x198] sm:$0xff] (%p1839_p3) }
 0x11c   : > { %1632 = vst.msk [vmem:[%s1894_s27 + $0x3d0] sm:$0xff] %vm553_vm0, %v1745_v59 }
 0x11d   : > { %1278 = vst [vmem:[%s2380_s16 + $0x170] sm:$0xff] (%p1839_p3), %v1277_v24  ;;  %v1405_v24 = vld [vmem:[%s1894_s27 + $0x2b8] sm:$0xff] (%p1839_p3) }
 0x11e   : > { %1280 = vst [vmem:[%s2380_s16 + $0x180] sm:$0xff] (%p1839_p3), %v1279_v25  ;;  %v1407_v25 = vld [vmem:[%s1894_s27 + $0x2c0] sm:$0xff] (%p1839_p3) }
 0x11f   : > { %1282 = vst [vmem:[%s2380_s16 + $0x190] sm:$0xff] (%p1839_p3), %v1281_v26  ;;  %v1409_v26 = vld [vmem:[%s1894_s27 + $0x2c8] sm:$0xff] (%p1839_p3) }
 0x120   : > { %v526_v60 = vpop.permute.xlu1 %525  ;;  %1284 = vst [vmem:[%s2380_s16 + $0x1a0] sm:$0xff] (%p1839_p3), %v1283_v27  ;;  %v1341_v56 = vld [vmem:[%s1894_s27 + $0x1b8] sm:$0xff] (%p1839_p3)  ;;  %v1411_v27 = vld [vmem:[%s1894_s27 + $0x2d0] sm:$0xff] (%p1839_p3) }
 0x121   : > { %612 = vst.msk [vmem:[%s1894_s27 + $0x1d0] sm:$0xff] %vm553_vm0, %v526_v60  ;;  %v521_v61 = vpop.permute.xlu0 %520  ;;  %v1746_v60 = vld [vmem:[%s2652_s1 + $0x3b] ss:$0 sm:$0xff]  ;;  %v1339_v55 = vld [vmem:[%s1894_s27 + $0x1b0] sm:$0xff] (%p1839_p3) }
 0x122   : > { %611 = vst.msk [vmem:[%s1894_s27 + $0x1c8] sm:$0xff] %vm553_vm0, %v521_v61  ;;  %v1747_v61 = vld [vmem:[%s2652_s1 + $0x3c] ss:$0 sm:$0xff] }
 0x123   : > { %1633 = vst.msk [vmem:[%s1894_s27 + $0x3d8] sm:$0xff] %vm553_vm0, %v1746_v60  ;;  %v1349_v60 = vld [vmem:[%s1894_s27 + $0x1d8] sm:$0xff] (%p1839_p3) }
 0x124   : > { %1634 = vst.msk [vmem:[%s1894_s27 + $0x3e0] sm:$0xff] %vm553_vm0, %v1747_v61 }
 0x125   : > { %1286 = vst [vmem:[%s2380_s16 + $0x1b0] sm:$0xff] (%p1839_p3), %v1285_v28  ;;  %v1413_v28 = vld [vmem:[%s1894_s27 + $0x2d8] sm:$0xff] (%p1839_p3) }
 0x126   : > { %1288 = vst [vmem:[%s2380_s16 + $0x1c0] sm:$0xff] (%p1839_p3), %v1287_v29  ;;  %v1415_v29 = vld [vmem:[%s1894_s27 + $0x2e0] sm:$0xff] (%p1839_p3) }
 0x127   : > { %1290 = vst [vmem:[%s2380_s16 + $0x1d0] sm:$0xff] (%p1839_p3), %v1289_v30  ;;  %v1417_v30 = vld [vmem:[%s1894_s27 + $0x2e8] sm:$0xff] (%p1839_p3) }
 0x128   : > { %v541_v0 = vpop.permute.xlu1 %540  ;;  %1292 = vst [vmem:[%s2380_s16 + $0x1e0] sm:$0xff] (%p1839_p3), %v1291_v31  ;;  %v1347_v59 = vld [vmem:[%s1894_s27 + $0x1d0] sm:$0xff] (%p1839_p3) }
 0x129   : > { %615 = vst.msk [vmem:[%s1894_s27 + $0x1e8] sm:$0xff] %vm553_vm0, %v541_v0  ;;  %v536_v2 = vpop.permute.xlu0 %535  ;;  %v1750_v0 = vld [vmem:[%s2652_s1 + $0x3f] ss:$0 sm:$0xff]  ;;  %v1345_v58 = vld [vmem:[%s1894_s27 + $0x1c8] sm:$0xff] (%p1839_p3)  ;;  %v1419_v31 = vld [vmem:[%s1894_s27 + $0x2f0] sm:$0xff] (%p1839_p3) }
 0x12a   : > { %614 = vst.msk [vmem:[%s1894_s27 + $0x1e0] sm:$0xff] %vm553_vm0, %v536_v2  ;;  %v1233_v2 = vld [vmem:[%s1894_s27 + $0x8] sm:$0xff] (%p1839_p3) }
 0x12b   : > { %1637 = vst.msk [vmem:[%s1894_s27 + $0x3f8] sm:$0xff] %vm553_vm0, %v1750_v0 }
 0x12c   : > { %1234 = vst [vmem:[%s2380_s16 + $0x10] sm:$0xff] (%p1839_p3), %v1233_v2  ;;  %v1361_v2 = vld [vmem:[%s1894_s27 + $0x208] sm:$0xff] (%p1839_p3) }
 0x12d   : > { %1294 = vst [vmem:[%s2380_s16 + $0x1f0] sm:$0xff] (%p1839_p3), %v1293_v32  ;;  %v1421_v32 = vld [vmem:[%s1894_s27 + $0x2f8] sm:$0xff] (%p1839_p3) }
 0x12e   : > { %945 = sbr.rel (!%p1839_p3) target bundleno = 400 (0x190), region = 32  ;;  %1296 = vst [vmem:[%s2380_s16 + $0x200] sm:$0xff] (%p1839_p3), %v1295_v33  ;;  %v1423_v33 = vld [vmem:[%s1894_s27 + $0x300] sm:$0xff] (%p1839_p3) }
 0x12f   : > { %1298 = vst [vmem:[%s2380_s16 + $0x210] sm:$0xff] (%p1839_p3), %v1297_v34  ;;  %v1425_v34 = vld [vmem:[%s1894_s27 + $0x308] sm:$0xff] (%p1839_p3) }
 0x130   : > { %1300 = vst [vmem:[%s2380_s16 + $0x220] sm:$0xff] (%p1839_p3), %v1299_v35  ;;  %v1353_v62 = vld [vmem:[%s1894_s27 + $0x1e8] sm:$0xff] (%p1839_p3)  ;;  %v1427_v35 = vld [vmem:[%s1894_s27 + $0x310] sm:$0xff] (%p1839_p3) }
 0x131   : > { %v551_v10 = vpop.permute.xlu0 %550  ;;  %1302 = vst [vmem:[%s2380_s16 + $0x230] sm:$0xff] (%p1839_p3), %v1301_v36  ;;  %v1351_v61 = vld [vmem:[%s1894_s27 + $0x1e0] sm:$0xff] (%p1839_p3)  ;;  %v1429_v36 = vld [vmem:[%s1894_s27 + $0x318] sm:$0xff] (%p1839_p3) }
 0x132   : > { %617 = vst.msk [vmem:[%s1894_s27 + $0x1f8] sm:$0xff] %vm553_vm0, %v551_v10  ;;  %v1249_v10 = vld [vmem:[%s1894_s27 + $0x48] sm:$0xff] (%p1839_p3) }
 0x133   : > { %1250 = vst [vmem:[%s2380_s16 + $0x90] sm:$0xff] %v1249_v10  ;;  %v1377_v10 = vld [vmem:[%s1894_s27 + $0x248] sm:$0xff] }
 0x134   : > { %1304 = vst [vmem:[%s2380_s16 + $0x240] sm:$0xff] %v1303_v37  ;;  %v1431_v37 = vld [vmem:[%s1894_s27 + $0x320] sm:$0xff] }
 0x135   : > { %1306 = vst [vmem:[%s2380_s16 + $0x250] sm:$0xff] %v1305_v38  ;;  %v1433_v38 = vld [vmem:[%s1894_s27 + $0x328] sm:$0xff] }
 0x136   : > { %1308 = vst [vmem:[%s2380_s16 + $0x260] sm:$0xff] %v1307_v39  ;;  %v1435_v39 = vld [vmem:[%s1894_s27 + $0x330] sm:$0xff] }
 0x137   : > { %1310 = vst [vmem:[%s2380_s16 + $0x270] sm:$0xff] %v1309_v40  ;;  %v1437_v40 = vld [vmem:[%s1894_s27 + $0x338] sm:$0xff] }
 0x138   : > { %1312 = vst [vmem:[%s2380_s16 + $0x280] sm:$0xff] %v1311_v41  ;;  %v1439_v41 = vld [vmem:[%s1894_s27 + $0x340] sm:$0xff] }
 0x139   : > { %1314 = vst [vmem:[%s2380_s16 + $0x290] sm:$0xff] %v1313_v42  ;;  %v1357_v0 = vld [vmem:[%s1894_s27 + $0x1f8] sm:$0xff]  ;;  %v1441_v42 = vld [vmem:[%s1894_s27 + $0x348] sm:$0xff] }
 0x13a   : > { %1316 = vst [vmem:[%s2380_s16 + $0x2a0] sm:$0xff] %v1315_v43  ;;  %v1443_v43 = vld [vmem:[%s1894_s27 + $0x350] sm:$0xff] }
 0x13b   : > { %1318 = vst [vmem:[%s2380_s16 + $0x2b0] sm:$0xff] %v1317_v44  ;;  %v1445_v44 = vld [vmem:[%s1894_s27 + $0x358] sm:$0xff] }
 0x13c   : > { %1320 = vst [vmem:[%s2380_s16 + $0x2c0] sm:$0xff] %v1319_v45  ;;  %v1447_v45 = vld [vmem:[%s1894_s27 + $0x360] sm:$0xff] }
 0x13d   : > { %1322 = vst [vmem:[%s2380_s16 + $0x2d0] sm:$0xff] %v1321_v46  ;;  %v1449_v46 = vld [vmem:[%s1894_s27 + $0x368] sm:$0xff] }
 0x13e   : > { %1324 = vst [vmem:[%s2380_s16 + $0x2e0] sm:$0xff] %v1323_v47  ;;  %v1451_v47 = vld [vmem:[%s1894_s27 + $0x370] sm:$0xff] }
 0x13f   : > { %1326 = vst [vmem:[%s2380_s16 + $0x2f0] sm:$0xff] %v1325_v48  ;;  %v1453_v48 = vld [vmem:[%s1894_s27 + $0x378] sm:$0xff] }
 0x140   : > { %1328 = vst [vmem:[%s2380_s16 + $0x300] sm:$0xff] %v1327_v49  ;;  %v1455_v49 = vld [vmem:[%s1894_s27 + $0x380] sm:$0xff] }
 0x141   : > { %1330 = vst [vmem:[%s2380_s16 + $0x310] sm:$0xff] %v1329_v50  ;;  %v1457_v50 = vld [vmem:[%s1894_s27 + $0x388] sm:$0xff] }
 0x142   : > { %1332 = vst [vmem:[%s2380_s16 + $0x320] sm:$0xff] %v1331_v51  ;;  %v1459_v51 = vld [vmem:[%s1894_s27 + $0x390] sm:$0xff] }
 0x143   : > { %1334 = vst [vmem:[%s2380_s16 + $0x330] sm:$0xff] %v1333_v52  ;;  %v1461_v52 = vld [vmem:[%s1894_s27 + $0x398] sm:$0xff] }
 0x144   : > { %1336 = vst [vmem:[%s2380_s16 + $0x340] sm:$0xff] %v1335_v53  ;;  %v1463_v53 = vld [vmem:[%s1894_s27 + $0x3a0] sm:$0xff] }
 0x145   : > { %1338 = vst [vmem:[%s2380_s16 + $0x350] sm:$0xff] %v1337_v54  ;;  %v1465_v54 = vld [vmem:[%s1894_s27 + $0x3a8] sm:$0xff] }
 0x146   : > { %1340 = vst [vmem:[%s2380_s16 + $0x360] sm:$0xff] %v1339_v55  ;;  %v1467_v55 = vld [vmem:[%s1894_s27 + $0x3b0] sm:$0xff] }
 0x147   : > { %1342 = vst [vmem:[%s2380_s16 + $0x370] sm:$0xff] %v1341_v56  ;;  %v1469_v56 = vld [vmem:[%s1894_s27 + $0x3b8] sm:$0xff] }
 0x148   : > { %1344 = vst [vmem:[%s2380_s16 + $0x380] sm:$0xff] %v1343_v57  ;;  %v1471_v57 = vld [vmem:[%s1894_s27 + $0x3c0] sm:$0xff] }
 0x149   : > { %1346 = vst [vmem:[%s2380_s16 + $0x390] sm:$0xff] %v1345_v58  ;;  %v1473_v58 = vld [vmem:[%s1894_s27 + $0x3c8] sm:$0xff] }
 0x14a   : > { %1348 = vst [vmem:[%s2380_s16 + $0x3a0] sm:$0xff] %v1347_v59  ;;  %v1475_v59 = vld [vmem:[%s1894_s27 + $0x3d0] sm:$0xff] }
 0x14b   : > { %1350 = vst [vmem:[%s2380_s16 + $0x3b0] sm:$0xff] %v1349_v60  ;;  %v1477_v60 = vld [vmem:[%s1894_s27 + $0x3d8] sm:$0xff] }
 0x14c   : > { %1352 = vst [vmem:[%s2380_s16 + $0x3c0] sm:$0xff] %v1351_v61  ;;  %v1479_v61 = vld [vmem:[%s1894_s27 + $0x3e0] sm:$0xff] }
 0x14d   : > { %1354 = vst [vmem:[%s2380_s16 + $0x3d0] sm:$0xff] %v1353_v62  ;;  %v1481_v62 = vld [vmem:[%s1894_s27 + $0x3e8] sm:$0xff] }
 0x14e   : > { %1356 = vst [vmem:[%s2380_s16 + $0x3e0] sm:$0xff] %v1355_v63  ;;  %v1483_v63 = vld [vmem:[%s1894_s27 + $0x3f0] sm:$0xff] }
 0x14f   : > { %1358 = vst [vmem:[%s2380_s16 + $0x3f0] sm:$0xff] %v1357_v0  ;;  %v1485_v0 = vld [vmem:[%s1894_s27 + $0x3f8] sm:$0xff] }
 0x150   : > { %1360 = vst [vmem:[%s2380_s16 + $0x400] sm:$0xff] %v1359_v1 }
 0x151   : > { %1362 = vst [vmem:[%s2380_s16 + $0x410] sm:$0xff] %v1361_v2 }
 0x152   : > { %1364 = vst [vmem:[%s2380_s16 + $0x420] sm:$0xff] %v1363_v3 }
 0x153   : > { %1366 = vst [vmem:[%s2380_s16 + $0x430] sm:$0xff] %v1365_v4 }
 0x154   : > { %1368 = vst [vmem:[%s2380_s16 + $0x440] sm:$0xff] %v1367_v5 }
 0x155   : > { %1370 = vst [vmem:[%s2380_s16 + $0x450] sm:$0xff] %v1369_v6 }
 0x156   : > { %1372 = vst [vmem:[%s2380_s16 + $0x460] sm:$0xff] %v1371_v7 }
 0x157   : > { %1374 = vst [vmem:[%s2380_s16 + $0x470] sm:$0xff] %v1373_v8 }
 0x158   : > { %1376 = vst [vmem:[%s2380_s16 + $0x480] sm:$0xff] %v1375_v9 }
 0x159   : > { %1378 = vst [vmem:[%s2380_s16 + $0x490] sm:$0xff] %v1377_v10 }
 0x15a   : > { %1380 = vst [vmem:[%s2380_s16 + $0x4a0] sm:$0xff] %v1379_v11 }
 0x15b   : > { %1382 = vst [vmem:[%s2380_s16 + $0x4b0] sm:$0xff] %v1381_v12 }
 0x15c   : > { %1384 = vst [vmem:[%s2380_s16 + $0x4c0] sm:$0xff] %v1383_v13 }
 0x15d   : > { %1386 = vst [vmem:[%s2380_s16 + $0x4d0] sm:$0xff] %v1385_v14 }
 0x15e   : > { %1388 = vst [vmem:[%s2380_s16 + $0x4e0] sm:$0xff] %v1387_v15 }
 0x15f   : > { %1390 = vst [vmem:[%s2380_s16 + $0x4f0] sm:$0xff] %v1389_v16 }
 0x160   : > { %1392 = vst [vmem:[%s2380_s16 + $0x500] sm:$0xff] %v1391_v17 }
 0x161   : > { %1394 = vst [vmem:[%s2380_s16 + $0x510] sm:$0xff] %v1393_v18 }
 0x162   : > { %1396 = vst [vmem:[%s2380_s16 + $0x520] sm:$0xff] %v1395_v19 }
 0x163   : > { %1398 = vst [vmem:[%s2380_s16 + $0x530] sm:$0xff] %v1397_v20 }
 0x164   : > { %1400 = vst [vmem:[%s2380_s16 + $0x540] sm:$0xff] %v1399_v21 }
 0x165   : > { %1402 = vst [vmem:[%s2380_s16 + $0x550] sm:$0xff] %v1401_v22 }
 0x166   : > { %1404 = vst [vmem:[%s2380_s16 + $0x560] sm:$0xff] %v1403_v23 }
 0x167   : > { %1406 = vst [vmem:[%s2380_s16 + $0x570] sm:$0xff] %v1405_v24 }
 0x168   : > { %1408 = vst [vmem:[%s2380_s16 + $0x580] sm:$0xff] %v1407_v25 }
 0x169   : > { %1410 = vst [vmem:[%s2380_s16 + $0x590] sm:$0xff] %v1409_v26 }
 0x16a   : > { %1412 = vst [vmem:[%s2380_s16 + $0x5a0] sm:$0xff] %v1411_v27 }
 0x16b   : > { %1414 = vst [vmem:[%s2380_s16 + $0x5b0] sm:$0xff] %v1413_v28 }
 0x16c   : > { %1416 = vst [vmem:[%s2380_s16 + $0x5c0] sm:$0xff] %v1415_v29 }
 0x16d   : > { %1418 = vst [vmem:[%s2380_s16 + $0x5d0] sm:$0xff] %v1417_v30 }
 0x16e   : > { %1420 = vst [vmem:[%s2380_s16 + $0x5e0] sm:$0xff] %v1419_v31 }
 0x16f   : > { %1422 = vst [vmem:[%s2380_s16 + $0x5f0] sm:$0xff] %v1421_v32 }
 0x170   : > { %1424 = vst [vmem:[%s2380_s16 + $0x600] sm:$0xff] %v1423_v33 }
 0x171   : > { %1426 = vst [vmem:[%s2380_s16 + $0x610] sm:$0xff] %v1425_v34 }
 0x172   : > { %1428 = vst [vmem:[%s2380_s16 + $0x620] sm:$0xff] %v1427_v35 }
 0x173   : > { %1430 = vst [vmem:[%s2380_s16 + $0x630] sm:$0xff] %v1429_v36 }
 0x174   : > { %1432 = vst [vmem:[%s2380_s16 + $0x640] sm:$0xff] %v1431_v37 }
 0x175   : > { %1434 = vst [vmem:[%s2380_s16 + $0x650] sm:$0xff] %v1433_v38 }
 0x176   : > { %1436 = vst [vmem:[%s2380_s16 + $0x660] sm:$0xff] %v1435_v39 }
 0x177   : > { %1438 = vst [vmem:[%s2380_s16 + $0x670] sm:$0xff] %v1437_v40 }
 0x178   : > { %1440 = vst [vmem:[%s2380_s16 + $0x680] sm:$0xff] %v1439_v41 }
 0x179   : > { %1442 = vst [vmem:[%s2380_s16 + $0x690] sm:$0xff] %v1441_v42 }
 0x17a   : > { %1444 = vst [vmem:[%s2380_s16 + $0x6a0] sm:$0xff] %v1443_v43 }
 0x17b   : > { %1446 = vst [vmem:[%s2380_s16 + $0x6b0] sm:$0xff] %v1445_v44 }
 0x17c   : > { %1448 = vst [vmem:[%s2380_s16 + $0x6c0] sm:$0xff] %v1447_v45 }
 0x17d   : > { %1450 = vst [vmem:[%s2380_s16 + $0x6d0] sm:$0xff] %v1449_v46 }
 0x17e   : > { %1452 = vst [vmem:[%s2380_s16 + $0x6e0] sm:$0xff] %v1451_v47 }
 0x17f   : > { %1454 = vst [vmem:[%s2380_s16 + $0x6f0] sm:$0xff] %v1453_v48 }
 0x180   : > { %1456 = vst [vmem:[%s2380_s16 + $0x700] sm:$0xff] %v1455_v49 }
 0x181   : > { %1458 = vst [vmem:[%s2380_s16 + $0x710] sm:$0xff] %v1457_v50 }
 0x182   : > { %1460 = vst [vmem:[%s2380_s16 + $0x720] sm:$0xff] %v1459_v51 }
 0x183   : > { %1462 = vst [vmem:[%s2380_s16 + $0x730] sm:$0xff] %v1461_v52 }
 0x184   : > { %1464 = vst [vmem:[%s2380_s16 + $0x740] sm:$0xff] %v1463_v53 }
 0x185   : > { %1466 = vst [vmem:[%s2380_s16 + $0x750] sm:$0xff] %v1465_v54 }
 0x186   : > { %1468 = vst [vmem:[%s2380_s16 + $0x760] sm:$0xff] %v1467_v55 }
 0x187   : > { %1470 = vst [vmem:[%s2380_s16 + $0x770] sm:$0xff] %v1469_v56 }
 0x188   : > { %1472 = vst [vmem:[%s2380_s16 + $0x780] sm:$0xff] %v1471_v57 }
 0x189   : > { %1474 = vst [vmem:[%s2380_s16 + $0x790] sm:$0xff] %v1473_v58 }
 0x18a   : > { %1476 = vst [vmem:[%s2380_s16 + $0x7a0] sm:$0xff] %v1475_v59 }
 0x18b   : > { %1478 = vst [vmem:[%s2380_s16 + $0x7b0] sm:$0xff] %v1477_v60 }
 0x18c   : > { %1480 = vst [vmem:[%s2380_s16 + $0x7c0] sm:$0xff] %v1479_v61 }
 0x18d   : > { %1482 = vst [vmem:[%s2380_s16 + $0x7d0] sm:$0xff] %v1481_v62 }
 0x18e   : > { %1484 = vst [vmem:[%s2380_s16 + $0x7e0] sm:$0xff] %v1483_v63 }
 0x18f   : > { %1486 = vst [vmem:[%s2380_s16 + $0x7f0] sm:$0xff] %v1485_v0 }
 0x190 PF: > { %s12_s13 = sadd.s32 1, %s1789_s13   ;;  %s2655_s9 = smov %s1777_s10 }
 0x191   : > { %p9_p9 = scmp.ge.s32.totalorder %s12_s13, 4   ;;  %s2656_s10 = smov %s1848_s19 }
 0x192   : > { %s2657_s11 = smov %s1785_s12  ;;  %s2658_s12 = smov %s2660_s15 }
 0x193   :  { %11 = sbr.rel (!%p9_p9) target bundleno = 3 (0x3), region = 100 }

</bundles_post_ra>
